<compile_context>
chip_gen: v6e
topology: v6e:2x2x1
jax: 0.10.0
libtpu: 0.0.40
codegen_flags: <defaults>
</compile_context>

<pallas_src>
import functools

import jax
import jax.numpy as jnp
from jax.experimental import pallas as pl
from jax.experimental.pallas import tpu as pltpu

LATENT_DIM = 32
UNITS = 32
assert LATENT_DIM == UNITS  # required by the stacked (out, in) weight slab


def _lrelu(v):
    # leaky_relu(v, 0.2) == max(v, 0.2*v) for slopes in (0, 1): mul+max.
    return jnp.maximum(v, 0.2 * v)


def _model_kernel(xs_ref, z_ref, w1_ref, wstack_ref, bstack_ref, bf4_ref,
                  out_ref, acc_ref):
    """Grid = (batch_tiles, P).  Feature-major: activations are (feat, tb)."""
    p = pl.program_id(1)
    n_p = pl.num_programs(1)

    xs = xs_ref[...]                       # (2, tb)   x1000 folded into w1
    w1 = w1_ref[...]                       # (UNITS, 2)

    # --- per-particle phi MLP (feature-major) ----------------------------
    # Layer 1 has K=2: two VPU FMAs instead of a degenerate MXU matmul.
    h = w1[:, 0:1] * xs[0:1, :] + w1[:, 1:2] * xs[1:2, :] + bstack_ref[0]
    h = _lrelu(h)                                                    # (32, tb)
    h = _lrelu(jnp.dot(wstack_ref[0], h,
                       preferred_element_type=jnp.float32) + bstack_ref[1])
    h = _lrelu(jnp.dot(wstack_ref[1], h,
                       preferred_element_type=jnp.float32) + bstack_ref[2])

    # --- z-weighted sum over particles: reduce across the p grid axis ----
    contrib = z_ref[...] * h               # (1, tb) row * (32, tb): sublane bcast

    @pl.when(p == 0)
    def _():
        acc_ref[...] = contrib

    @pl.when(p > 0)
    def _():
        acc_ref[...] += contrib

    # --- f MLP head, only on the last particle step ------------------------
    @pl.when(p == n_p - 1)
    def _():
        s = acc_ref[...]                                             # (32, tb)
        s = _lrelu(jnp.dot(wstack_ref[2], s,
                           preferred_element_type=jnp.float32) + bstack_ref[3])
        s = _lrelu(jnp.dot(wstack_ref[3], s,
                           preferred_element_type=jnp.float32) + bstack_ref[4])
        s = _lrelu(jnp.dot(wstack_ref[4], s,
                           preferred_element_type=jnp.float32) + bstack_ref[5])
        # Final layer has N=1: VPU multiply + sublane reduce -> lane-dense (1, tb).
        out = jnp.sum(s * bstack_ref[6], axis=0, keepdims=True) + bf4_ref[0, 0]
        out_ref[...] = out.astype(out_ref.dtype)


def init_params(key):
    """Deterministic init mimicking torch.nn.Linear defaults.
    Weights stored as (in, out) so the reference model does x @ W + b."""
    shapes = [
        ("w1", (2, UNITS)), ("b1", (1, UNITS)),
        ("w2", (UNITS, UNITS)), ("b2", (1, UNITS)),
        ("w3", (UNITS, LATENT_DIM)), ("b3", (1, LATENT_DIM)),
        ("wf1", (LATENT_DIM, UNITS)), ("bf1", (1, UNITS)),
        ("wf2", (UNITS, UNITS)), ("bf2", (1, UNITS)),
        ("wf3", (UNITS, UNITS)), ("bf3", (1, UNITS)),
        ("wf4", (UNITS, 1)), ("bf4", (1, 1)),
    ]
    params = {}
    keys = jax.random.split(key, len(shapes))
    for (name, shape), k in zip(shapes, keys):
        fan_in = shape[0] if name.startswith("w") else shape[1]
        bound = 1.0 / jnp.sqrt(jnp.float32(fan_in))
        params[name] = jax.random.uniform(
            k, shape, jnp.float32, minval=-bound, maxval=bound)
    return params


def _pick_tb(B):
    """Batch tile (jets per grid step).

    Lane-aligned (multiple of 128) for non-tiny batches, aiming for >=4 batch
    tiles so (a) the "parallel" batch axis shards across both TensorCores on
    v7x and (b) the xs/z DMA of step i+1 overlaps compute of step i on every
    generation.  The per-particle grid keeps the per-step VMEM footprint tiny
    (a few hundred KiB even at tb=1024), so tb is overhead/parallelism driven,
    not VMEM driven; batches not divisible by tb are padded in the wrapper.
    """
    if B <= 128:
        return B          # single full-width tile (block == full array dims)
    tb = 128
    while tb < 1024 and B // (tb * 2) >= 4:
        tb *= 2
    return tb


@functools.partial(jax.jit, static_argnames=("tb",))
def model_forward(x, params, *, tb=None):
    B, P, F = x.shape
    assert F == 3
    if tb is None:
        tb = _pick_tb(B)
    nb = -(-B // tb)          # ceil(B / tb)
    Bp = nb * tb

    # ---- layout plumbing (plain JAX, outside the kernel) -------------------
    # Particle-major, feature-major, batch last: every kernel block is
    # lane-dense and the HBM->VMEM DMA is contiguous per row.
    zs = jnp.transpose(x[:, :, 0], (1, 0)).reshape(P, 1, B)         # (P, 1, B)
    xs = jnp.transpose(x[:, :, 1:3], (1, 2, 0))                     # (P, 2, B)
    if Bp != B:
        # Pad the batch to a multiple of the tile.  Padded jets have z == 0,
        # so they only produce garbage in rows we slice off below.
        zs = jnp.pad(zs, ((0, 0), (0, 0), (0, Bp - B)))
        xs = jnp.pad(xs, ((0, 0), (0, 0), (0, Bp - B)))

    # ---- weight prep --------------------------------------------------------
    # x1000 folded into layer-1 weights; all matmul weights pre-transposed to
    # (out, in) for the feature-major layout; consolidated into two slabs.
    w1t = (params["w1"] * 1000.0).T                                  # (32, 2)
    wstack = jnp.stack([params["w2"].T, params["w3"].T, params["wf1"].T,
                        params["wf2"].T, params["wf3"].T], axis=0)   # (5,32,32)
    bstack = jnp.stack([params["b1"].T, params["b2"].T, params["b3"].T,
                        params["bf1"].T, params["bf2"].T, params["bf3"].T,
                        params["wf4"]], axis=0)                      # (7,32,1)
    bf4 = params["bf4"].reshape(1, 1)

    in_specs = [
        pl.BlockSpec((None, 2, tb), lambda i, p: (p, 0, i)),         # kinematics
        pl.BlockSpec((None, 1, tb), lambda i, p: (p, 0, i)),         # z weights
        pl.BlockSpec((UNITS, 2), lambda i, p: (0, 0)),               # w1 (scaled)
        pl.BlockSpec((5, UNITS, UNITS), lambda i, p: (0, 0, 0)),     # 32x32 slab
        pl.BlockSpec((7, UNITS, 1), lambda i, p: (0, 0, 0)),         # bias slab
        pl.BlockSpec(memory_space=pltpu.MemorySpace.SMEM),           # bf4 scalar
    ]

    out = pl.pallas_call(
        _model_kernel,
        out_shape=jax.ShapeDtypeStruct((1, Bp), jnp.float32),
        grid_spec=pltpu.PrefetchScalarGridSpec(
            num_scalar_prefetch=0,
            grid=(nb, P),                      # reduction (particle) axis last
            in_specs=in_specs,
            out_specs=pl.BlockSpec((1, tb), lambda i, p: (0, i)),
            scratch_shapes=[pltpu.VMEM((LATENT_DIM, tb), jnp.float32)],
        ),
        compiler_params=pltpu.CompilerParams(
            dimension_semantics=("parallel", "arbitrary"),
            vmem_limit_bytes=32 * 1024 * 1024,   # safe on v5e/v6e/v7x; usage ~1 MiB
        ),
    )(xs, zs, w1t, wstack, bstack, bf4)

    return out[0, :B].reshape(B, 1)


def reference_forward(x, params):
    zs = x[:, :, 0]
    xs = x[:, :, 1:3] * 1000.0
    h = _lrelu(xs @ params["w1"] + params["b1"])
    h = _lrelu(h @ params["w2"] + params["b2"])
    h = _lrelu(h @ params["w3"] + params["b3"])
    s = jnp.sum(h * zs[:, :, None], axis=1)
    s = _lrelu(s @ params["wf1"] + params["bf1"])
    s = _lrelu(s @ params["wf2"] + params["bf2"])
    s = _lrelu(s @ params["wf3"] + params["bf3"])
    return s @ params["wf4"] + params["bf4"]


if __name__ == "__main__":
    key = jax.random.PRNGKey(0)
    kx, kp = jax.random.split(key)
    params = init_params(kp)

    # Tolerance: MXU dots at default precision run a single bf16 pass, so
    # bit-exactness against a pure-f32 reference is not expected.  Use
    # precision=jax.lax.Precision.HIGHEST in the dots if bit-closeness matters.
    TOL = dict(atol=2e-3, rtol=2e-3)

    # Small batch: single tile, grid = (1, P).
    B, P = 16, 8
    x = jax.random.normal(kx, (B, P, 3), jnp.float32) * 0.01
    out = jax.block_until_ready(model_forward(x, params))
    ref = reference_forward(x, params)
    assert out.shape == (B, 1)
    assert jnp.allclose(out, ref, **TOL), (out, ref)

    # Larger, non-multiple-of-128 batch: exercises padding + the multi-tile
    # "parallel" batch axis (grid = (2, P), tb = 128).
    B2 = 200
    x2 = jax.random.normal(jax.random.PRNGKey(1), (B2, P, 3), jnp.float32) * 0.01
    out2 = jax.block_until_ready(model_forward(x2, params))
    ref2 = reference_forward(x2, params)
    assert out2.shape == (B2, 1)
    assert jnp.allclose(out2, ref2, **TOL), (out2, ref2)

    print("KERNEL_OK")
</pallas_src>

<mosaic_0001>
module attributes {stable_mosaic.version = 11 : i64} {
  func.func @_model_kernel(%arg0: i32, %arg1: i32, %arg2: memref<1x2x16xf32, #tpu.memory_space<vmem>>, %arg3: memref<1x1x16xf32, #tpu.memory_space<vmem>>, %arg4: memref<32x2xf32, #tpu.memory_space<vmem>>, %arg5: memref<5x32x32xf32, #tpu.memory_space<vmem>>, %arg6: memref<7x32x1xf32, #tpu.memory_space<vmem>>, %arg7: memref<1x1xf32, #tpu.memory_space<smem>>, %arg8: memref<1x16xf32, #tpu.memory_space<vmem>>, %arg9: memref<32x16xf32, #tpu.memory_space<vmem>>) attributes {dimension_semantics = [#tpu.dimension_semantics<parallel>, #tpu.dimension_semantics<arbitrary>], iteration_bounds = array<i64: 1, 8>, scalar_prefetch = 0 : i64, scratch_operands = 1 : i64, tpu.core_type = #tpu.core_type<tc>, window_params = [{transform_indices = @transform_0, window_bounds = array<i64: 1, 2, 16>}, {transform_indices = @transform_1, window_bounds = array<i64: 1, 1, 16>}, {pipeline_mode = #tpu.pipeline_mode<synchronous>, transform_indices = @transform_2, window_bounds = array<i64: 32, 2>}, {pipeline_mode = #tpu.pipeline_mode<synchronous>, transform_indices = @transform_3, window_bounds = array<i64: 5, 32, 32>}, {pipeline_mode = #tpu.pipeline_mode<synchronous>, transform_indices = @transform_4, window_bounds = array<i64: 7, 32, 1>}, {transform_indices = @transform_5, window_bounds = array<i64: 1, 1>}, {transform_indices = @transform_6, window_bounds = array<i64: 1, 16>}]} {
    %c0 = arith.constant 0 : index
    %c0_0 = arith.constant 0 : index
    %c0_1 = arith.constant 0 : index
    %0 = vector.load %arg2[%c0, %c0_0, %c0_1] : memref<1x2x16xf32, #tpu.memory_space<vmem>>, vector<1x2x16xf32>
    %1 = vector.shape_cast %0 : vector<1x2x16xf32> to vector<2x16xf32>
    %c0_2 = arith.constant 0 : index
    %c0_3 = arith.constant 0 : index
    %2 = vector.load %arg4[%c0_2, %c0_3] : memref<32x2xf32, #tpu.memory_space<vmem>>, vector<32x2xf32>
    %3 = vector.extract_strided_slice %2 {offsets = [0, 0], sizes = [32, 1], strides = [1, 1]} : vector<32x2xf32> to vector<32x1xf32>
    %4 = vector.extract_strided_slice %1 {offsets = [0, 0], sizes = [1, 16], strides = [1, 1]} : vector<2x16xf32> to vector<1x16xf32>
    %5 = vector.broadcast %3 : vector<32x1xf32> to vector<32x16xf32>
    %6 = vector.broadcast %4 : vector<1x16xf32> to vector<32x16xf32>
    %7 = arith.mulf %5, %6 : vector<32x16xf32>
    %8 = vector.extract_strided_slice %2 {offsets = [0, 1], sizes = [32, 1], strides = [1, 1]} : vector<32x2xf32> to vector<32x1xf32>
    %9 = vector.extract_strided_slice %1 {offsets = [1, 0], sizes = [1, 16], strides = [1, 1]} : vector<2x16xf32> to vector<1x16xf32>
    %10 = vector.broadcast %8 : vector<32x1xf32> to vector<32x16xf32>
    %11 = vector.broadcast %9 : vector<1x16xf32> to vector<32x16xf32>
    %12 = arith.mulf %10, %11 : vector<32x16xf32>
    %13 = arith.addf %7, %12 : vector<32x16xf32>
    %c0_4 = arith.constant 0 : index
    %c0_5 = arith.constant 0 : index
    %c0_6 = arith.constant 0 : index
    %14 = vector.load %arg6[%c0_4, %c0_5, %c0_6] : memref<7x32x1xf32, #tpu.memory_space<vmem>>, vector<1x32x1xf32>
    %15 = vector.shape_cast %14 : vector<1x32x1xf32> to vector<32x1xf32>
    %16 = vector.broadcast %15 : vector<32x1xf32> to vector<32x16xf32>
    %17 = arith.addf %13, %16 : vector<32x16xf32>
    %cst = arith.constant 2.000000e-01 : f32
    %18 = vector.broadcast %cst : f32 to vector<32x16xf32>
    %19 = arith.mulf %18, %17 : vector<32x16xf32>
    %20 = arith.maximumf %17, %19 : vector<32x16xf32>
    %c0_7 = arith.constant 0 : index
    %c0_8 = arith.constant 0 : index
    %c0_9 = arith.constant 0 : index
    %21 = vector.load %arg5[%c0_7, %c0_8, %c0_9] : memref<5x32x32xf32, #tpu.memory_space<vmem>>, vector<1x32x32xf32>
    %22 = vector.shape_cast %21 : vector<1x32x32xf32> to vector<32x32xf32>
    %cst_10 = arith.constant dense<0.000000e+00> : vector<32x16xf32>
    %23 = tpu.matmul %22, %20, %cst_10 {dimension_numbers = #tpu.dot_dimension_numbers<[1], [0], [0], [1], [0, 0, 1, 1], [], []>} : vector<32x32xf32>, vector<32x16xf32>, vector<32x16xf32> -> vector<32x16xf32>
    %c1 = arith.constant 1 : index
    %c0_11 = arith.constant 0 : index
    %c0_12 = arith.constant 0 : index
    %24 = vector.load %arg6[%c1, %c0_11, %c0_12] : memref<7x32x1xf32, #tpu.memory_space<vmem>>, vector<1x32x1xf32>
    %25 = vector.shape_cast %24 : vector<1x32x1xf32> to vector<32x1xf32>
    %26 = vector.broadcast %25 : vector<32x1xf32> to vector<32x16xf32>
    %27 = arith.addf %23, %26 : vector<32x16xf32>
    %cst_13 = arith.constant 2.000000e-01 : f32
    %28 = vector.broadcast %cst_13 : f32 to vector<32x16xf32>
    %29 = arith.mulf %28, %27 : vector<32x16xf32>
    %30 = arith.maximumf %27, %29 : vector<32x16xf32>
    %c1_14 = arith.constant 1 : index
    %c0_15 = arith.constant 0 : index
    %c0_16 = arith.constant 0 : index
    %31 = vector.load %arg5[%c1_14, %c0_15, %c0_16] : memref<5x32x32xf32, #tpu.memory_space<vmem>>, vector<1x32x32xf32>
    %32 = vector.shape_cast %31 : vector<1x32x32xf32> to vector<32x32xf32>
    %cst_17 = arith.constant dense<0.000000e+00> : vector<32x16xf32>
    %33 = tpu.matmul %32, %30, %cst_17 {dimension_numbers = #tpu.dot_dimension_numbers<[1], [0], [0], [1], [0, 0, 1, 1], [], []>} : vector<32x32xf32>, vector<32x16xf32>, vector<32x16xf32> -> vector<32x16xf32>
    %c2 = arith.constant 2 : index
    %c0_18 = arith.constant 0 : index
    %c0_19 = arith.constant 0 : index
    %34 = vector.load %arg6[%c2, %c0_18, %c0_19] : memref<7x32x1xf32, #tpu.memory_space<vmem>>, vector<1x32x1xf32>
    %35 = vector.shape_cast %34 : vector<1x32x1xf32> to vector<32x1xf32>
    %36 = vector.broadcast %35 : vector<32x1xf32> to vector<32x16xf32>
    %37 = arith.addf %33, %36 : vector<32x16xf32>
    %cst_20 = arith.constant 2.000000e-01 : f32
    %38 = vector.broadcast %cst_20 : f32 to vector<32x16xf32>
    %39 = arith.mulf %38, %37 : vector<32x16xf32>
    %40 = arith.maximumf %37, %39 : vector<32x16xf32>
    %c0_21 = arith.constant 0 : index
    %c0_22 = arith.constant 0 : index
    %c0_23 = arith.constant 0 : index
    %41 = vector.load %arg3[%c0_21, %c0_22, %c0_23] : memref<1x1x16xf32, #tpu.memory_space<vmem>>, vector<1x1x16xf32>
    %42 = vector.shape_cast %41 : vector<1x1x16xf32> to vector<1x16xf32>
    %43 = vector.broadcast %42 : vector<1x16xf32> to vector<32x16xf32>
    %44 = arith.mulf %43, %40 : vector<32x16xf32>
    %c0_i32 = arith.constant 0 : i32
    %45 = arith.cmpi eq, %arg1, %c0_i32 : i32
    %46 = arith.extui %45 : i1 to i32
    %c0_i32_24 = arith.constant 0 : i32
    %47 = arith.cmpi ne, %46, %c0_i32_24 : i32
    scf.if %47 {
      %c0_28 = arith.constant 0 : index
      %c0_29 = arith.constant 0 : index
      %54 = vector.load %arg9[%c0_28, %c0_29] : memref<32x16xf32, #tpu.memory_space<vmem>>, vector<32x16xf32>
      tpu.vector_store %arg9[%c0_28, %c0_29], %44 {strides = array<i32>} : memref<32x16xf32, #tpu.memory_space<vmem>>, vector<32x16xf32>,
    } else {
    }
    %c0_i32_25 = arith.constant 0 : i32
    %48 = arith.cmpi sgt, %arg1, %c0_i32_25 : i32
    %49 = arith.extui %48 : i1 to i32
    %c0_i32_26 = arith.constant 0 : i32
    %50 = arith.cmpi ne, %49, %c0_i32_26 : i32
    scf.if %50 {
      %c0_28 = arith.constant 0 : index
      %c0_29 = arith.constant 0 : index
      %54 = vector.load %arg9[%c0_28, %c0_29] : memref<32x16xf32, #tpu.memory_space<vmem>>, vector<32x16xf32>
      %55 = arith.addf %54, %44 : vector<32x16xf32>
      %c0_30 = arith.constant 0 : index
      %c0_31 = arith.constant 0 : index
      %56 = vector.load %arg9[%c0_30, %c0_31] : memref<32x16xf32, #tpu.memory_space<vmem>>, vector<32x16xf32>
      tpu.vector_store %arg9[%c0_30, %c0_31], %55 {strides = array<i32>} : memref<32x16xf32, #tpu.memory_space<vmem>>, vector<32x16xf32>,
    } else {
    }
    %c7_i32 = arith.constant 7 : i32
    %51 = arith.cmpi eq, %arg1, %c7_i32 : i32
    %52 = arith.extui %51 : i1 to i32
    %c0_i32_27 = arith.constant 0 : i32
    %53 = arith.cmpi ne, %52, %c0_i32_27 : i32
    scf.if %53 {
      %c0_28 = arith.constant 0 : index
      %c0_29 = arith.constant 0 : index
      %54 = vector.load %arg9[%c0_28, %c0_29] : memref<32x16xf32, #tpu.memory_space<vmem>>, vector<32x16xf32>
      %c2_30 = arith.constant 2 : index
      %c0_31 = arith.constant 0 : index
      %c0_32 = arith.constant 0 : index
      %55 = vector.load %arg5[%c2_30, %c0_31, %c0_32] : memref<5x32x32xf32, #tpu.memory_space<vmem>>, vector<1x32x32xf32>
      %56 = vector.shape_cast %55 : vector<1x32x32xf32> to vector<32x32xf32>
      %cst_33 = arith.constant dense<0.000000e+00> : vector<32x16xf32>
      %57 = tpu.matmul %56, %54, %cst_33 {dimension_numbers = #tpu.dot_dimension_numbers<[1], [0], [0], [1], [0, 0, 1, 1], [], []>} : vector<32x32xf32>, vector<32x16xf32>, vector<32x16xf32> -> vector<32x16xf32>
      %c3 = arith.constant 3 : index
      %c0_34 = arith.constant 0 : index
      %c0_35 = arith.constant 0 : index
      %58 = vector.load %arg6[%c3, %c0_34, %c0_35] : memref<7x32x1xf32, #tpu.memory_space<vmem>>, vector<1x32x1xf32>
      %59 = vector.shape_cast %58 : vector<1x32x1xf32> to vector<32x1xf32>
      %60 = vector.broadcast %59 : vector<32x1xf32> to vector<32x16xf32>
      %61 = arith.addf %57, %60 : vector<32x16xf32>
      %cst_36 = arith.constant 2.000000e-01 : f32
      %62 = vector.broadcast %cst_36 : f32 to vector<32x16xf32>
      %63 = arith.mulf %62, %61 : vector<32x16xf32>
      %64 = arith.maximumf %61, %63 : vector<32x16xf32>
      %c3_37 = arith.constant 3 : index
      %c0_38 = arith.constant 0 : index
      %c0_39 = arith.constant 0 : index
      %65 = vector.load %arg5[%c3_37, %c0_38, %c0_39] : memref<5x32x32xf32, #tpu.memory_space<vmem>>, vector<1x32x32xf32>
      %66 = vector.shape_cast %65 : vector<1x32x32xf32> to vector<32x32xf32>
      %cst_40 = arith.constant dense<0.000000e+00> : vector<32x16xf32>
      %67 = tpu.matmul %66, %64, %cst_40 {dimension_numbers = #tpu.dot_dimension_numbers<[1], [0], [0], [1], [0, 0, 1, 1], [], []>} : vector<32x32xf32>, vector<32x16xf32>, vector<32x16xf32> -> vector<32x16xf32>
      %c4 = arith.constant 4 : index
      %c0_41 = arith.constant 0 : index
      %c0_42 = arith.constant 0 : index
      %68 = vector.load %arg6[%c4, %c0_41, %c0_42] : memref<7x32x1xf32, #tpu.memory_space<vmem>>, vector<1x32x1xf32>
      %69 = vector.shape_cast %68 : vector<1x32x1xf32> to vector<32x1xf32>
      %70 = vector.broadcast %69 : vector<32x1xf32> to vector<32x16xf32>
      %71 = arith.addf %67, %70 : vector<32x16xf32>
      %cst_43 = arith.constant 2.000000e-01 : f32
      %72 = vector.broadcast %cst_43 : f32 to vector<32x16xf32>
      %73 = arith.mulf %72, %71 : vector<32x16xf32>
      %74 = arith.maximumf %71, %73 : vector<32x16xf32>
      %c4_44 = arith.constant 4 : index
      %c0_45 = arith.constant 0 : index
      %c0_46 = arith.constant 0 : index
      %75 = vector.load %arg5[%c4_44, %c0_45, %c0_46] : memref<5x32x32xf32, #tpu.memory_space<vmem>>, vector<1x32x32xf32>
      %76 = vector.shape_cast %75 : vector<1x32x32xf32> to vector<32x32xf32>
      %cst_47 = arith.constant dense<0.000000e+00> : vector<32x16xf32>
      %77 = tpu.matmul %76, %74, %cst_47 {dimension_numbers = #tpu.dot_dimension_numbers<[1], [0], [0], [1], [0, 0, 1, 1], [], []>} : vector<32x32xf32>, vector<32x16xf32>, vector<32x16xf32> -> vector<32x16xf32>
      %c5 = arith.constant 5 : index
      %c0_48 = arith.constant 0 : index
      %c0_49 = arith.constant 0 : index
      %78 = vector.load %arg6[%c5, %c0_48, %c0_49] : memref<7x32x1xf32, #tpu.memory_space<vmem>>, vector<1x32x1xf32>
      %79 = vector.shape_cast %78 : vector<1x32x1xf32> to vector<32x1xf32>
      %80 = vector.broadcast %79 : vector<32x1xf32> to vector<32x16xf32>
      %81 = arith.addf %77, %80 : vector<32x16xf32>
      %cst_50 = arith.constant 2.000000e-01 : f32
      %82 = vector.broadcast %cst_50 : f32 to vector<32x16xf32>
      %83 = arith.mulf %82, %81 : vector<32x16xf32>
      %84 = arith.maximumf %81, %83 : vector<32x16xf32>
      %c6 = arith.constant 6 : index
      %c0_51 = arith.constant 0 : index
      %c0_52 = arith.constant 0 : index
      %85 = vector.load %arg6[%c6, %c0_51, %c0_52] : memref<7x32x1xf32, #tpu.memory_space<vmem>>, vector<1x32x1xf32>
      %86 = vector.shape_cast %85 : vector<1x32x1xf32> to vector<32x1xf32>
      %87 = vector.broadcast %86 : vector<32x1xf32> to vector<32x16xf32>
      %88 = arith.mulf %84, %87 : vector<32x16xf32>
      %cst_53 = arith.constant dense<0.000000e+00> : vector<16xf32>
      %89 = vector.multi_reduction <add>, %88, %cst_53 [0] : vector<32x16xf32> to vector<16xf32>
      %90 = vector.shape_cast %89 : vector<16xf32> to vector<1x16xf32>
      %c0_54 = arith.constant 0 : index
      %c0_55 = arith.constant 0 : index
      %91 = memref.load %arg7[%c0_54, %c0_55] : memref<1x1xf32, #tpu.memory_space<smem>>
      %92 = vector.broadcast %91 : f32 to vector<1x16xf32>
      %93 = arith.addf %90, %92 : vector<1x16xf32>
      %c0_56 = arith.constant 0 : index
      %c0_57 = arith.constant 0 : index
      %94 = vector.load %arg8[%c0_56, %c0_57] : memref<1x16xf32, #tpu.memory_space<vmem>>, vector<1x16xf32>
      tpu.vector_store %arg8[%c0_56, %c0_57], %93 {strides = array<i32>} : memref<1x16xf32, #tpu.memory_space<vmem>>, vector<1x16xf32>,
    } else {
    }
    return
  }
  func.func @transform_0(%arg0: i32, %arg1: i32) -> (i32, i32, i32) {
    %c0_i32 = arith.constant 0 : i32
    %c0_i32_0 = arith.constant 0 : i32
    return %arg1, %c0_i32, %arg0 : i32, i32, i32
  }
  func.func @transform_1(%arg0: i32, %arg1: i32) -> (i32, i32, i32) {
    %c0_i32 = arith.constant 0 : i32
    %c0_i32_0 = arith.constant 0 : i32
    return %arg1, %c0_i32, %arg0 : i32, i32, i32
  }
  func.func @transform_2(%arg0: i32, %arg1: i32) -> (i32, i32) {
    %c0_i32 = arith.constant 0 : i32
    %c0_i32_0 = arith.constant 0 : i32
    %c0_i32_1 = arith.constant 0 : i32
    return %c0_i32, %c0_i32_0 : i32, i32
  }
  func.func @transform_3(%arg0: i32, %arg1: i32) -> (i32, i32, i32) {
    %c0_i32 = arith.constant 0 : i32
    %c0_i32_0 = arith.constant 0 : i32
    %c0_i32_1 = arith.constant 0 : i32
    %c0_i32_2 = arith.constant 0 : i32
    return %c0_i32, %c0_i32_0, %c0_i32_1 : i32, i32, i32
  }
  func.func @transform_4(%arg0: i32, %arg1: i32) -> (i32, i32, i32) {
    %c0_i32 = arith.constant 0 : i32
    %c0_i32_0 = arith.constant 0 : i32
    %c0_i32_1 = arith.constant 0 : i32
    %c0_i32_2 = arith.constant 0 : i32
    return %c0_i32, %c0_i32_0, %c0_i32_1 : i32, i32, i32
  }
  func.func @transform_5(%arg0: i32, %arg1: i32) -> (i32, i32) {
    %c0_i32 = arith.constant 0 : i32
    %c0_i32_0 = arith.constant 0 : i32
    %c0_i32_1 = arith.constant 0 : i32
    return %c0_i32, %c0_i32_0 : i32, i32
  }
  func.func @transform_6(%arg0: i32, %arg1: i32) -> (i32, i32) {
    %c0_i32 = arith.constant 0 : i32
    %c0_i32_0 = arith.constant 0 : i32
    return %c0_i32, %arg0 : i32, i32
  }
}

</mosaic_0001>

<bundles_post_ra>
// kernel: model_forward.1
= control target key start
LH: loop header
LB: loop body
LE: loop exit
PB: predicated region body
PF: predicated region fallthrough
CT: control target
= control target key end

     0   :  { %s1794_s0 = inlined_call_operand.vmem [shape: f32[8,2,16], index: 0, kind: input, shape index: {}]   ;;  %s1795_s1 = inlined_call_operand.vmem [shape: f32[8,1,16], index: 1, kind: input, shape index: {}]   ;;  %s1796_s2 = inlined_call_operand.vmem [shape: f32[32,2], index: 2, kind: input, shape index: {}]   ;;  %s1797_s3 = inlined_call_operand.vmem [shape: f32[5,32,32], index: 3, kind: input, shape index: {}]   ;;  %s1798_s4 = inlined_call_operand.vmem [shape: f32[7,32,1], index: 4, kind: input, shape index: {}]   ;;  %s1799_s5 = inlined_call_operand.<no memory space> [shape: f32[1,1], index: 5, kind: input, shape index: {}]   ;;  %s1800_s6 = inlined_call_operand.hbm [shape: f32[1,16], index: 6, kind: output, shape index: {}]  }
   0x1   :  { %11 = sst [smem:[#allocation3]] %s1799_s5 }
   0x2   :  { %12 = vsyncpa [#allocation5], 0  ;;  %s1556_s23 = smov 0   ;;  %s1558_s24 = smov 0  }
   0x3   :  { %s1560_s25 = smov 0  }
   0x4 LB: > { %s1228_s5 = sadd.s32 4294967295, %s1512_s25   ;;  %s27_s26 = sadd.s32 1, %s1508_s24  ;;  %s1512_s25 = sphi %s1560_s25, %s18_s25   ;;  %s1508_s24 = sphi %s1558_s24, %s1803_s24   ;;  %s1504_s23 = sphi %s1556_s23, %s1802_s23  }
   0x5   : > { %p28_p0 = scmp.ge.s32.totalorder %s27_s26, 8  ;;  %p1231_p1 = scmp.ge.s32.totalorder %s1512_s25, 1 }
   0x6   : > { %p243_p2 = scmp.lt.s32.totalorder %s1512_s25, 9 }
   0x7   : > { %s1805_s26 = smov (%p28_p0, %s27_s26), 0 }
   0x8   : > { %p244_p3 = pnand %p1231_p1, %p243_p2 }
   0x9   : > { %p276_p4 = scmp.lt.s32.totalorder (!%p244_p3), %s1504_s23, 7  ;;  %p1254_p5 = scmp.ne.s32.totalorder (!%p244_p3), %s1504_s23, 0 }
   0xa   : > { %247 = sbr.rel (%p244_p3) target bundleno = 1287 (0x507), region = 44 }
   0xf   : > { %v293_v0 = vld [vmem:[%s1796_s2 + $0x18] sm:$0xff]  ;;  %v292_v1 = vld [vmem:[%s1796_s2 + $0x10] sm:$0xff]  ;;  %v1514_v2 = vmov 1   ;;  %v1515_v3 = vmov 0   ;;  %v291_v4 = vld [vmem:[%s1796_s2 + $0x8] sm:$0xff]  ;;  %vm415_vm0 = vcmask 261120   ;;  %v314_v19 = vlaneseq }
  0x10   : > { %1453 = vset.pattern.permute.xlu0 %v1514_v2  ;;  %1454 = vset.pattern.permute.xlu1 %v1515_v3  ;;  %v290_v5 = vld [vmem:[%s1796_s2] sm:$0xff]  ;;  %v353_v6 = vld [vmem:[%s1798_s4 + $0x18] sm:$0xff]  ;;  %v351_v7 = vld [vmem:[%s1798_s4 + $0x8] sm:$0xff]  ;;  %s1631_s17 = scalar_select %p276_p4, %s1504_s23, 7 }
  0x11   : > { %335 = vperm.xlu0 %1453, %v293_v0   ;;  %306 = vperm.xlu1 %1454, %v292_v1   ;;  %v1236_v8 = vld [vmem:[%s1798_s4 + $0x38] sm:$0xff]  ;;  %v352_v9 = vld [vmem:[%s1798_s4 + $0x10] sm:$0xff]  ;;  %v1234_v10 = vld [vmem:[%s1798_s4 + $0x28] sm:$0xff]  ;;  %v315_v20 = vshrl.u32 %v314_v19, 7 }
  0x12   : > { %v350_v11 = vld [vmem:[%s1798_s4] sm:$0xff]  ;;  %v1235_v13 = vld [vmem:[%s1798_s4 + $0x30] sm:$0xff]  ;;  %v1246_v17 = vld [vmem:[%s1798_s4 + $0x48] sm:$0xff]  ;;  %s1232_s18 = sshll.u32 %s1631_s17, 1  ;;  %s288_s19 = scalar_lea.vmem %s1795_s1, %s1631_s17 }
  0x13   : > { %v1245_v12 = vld [vmem:[%s1798_s4 + $0x40] sm:$0xff]  ;;  %v1247_v14 = vld [vmem:[%s1798_s4 + $0x50] sm:$0xff]  ;;  %v1248_v18 = vld [vmem:[%s1798_s4 + $0x58] sm:$0xff]  ;;  %s282_s21 = scalar_lea.vmem %s1794_s0, %s1232_s18  ;;  %v340_v23 = vsub.s32 1, %v315_v20  ;;  %v316_v24 = vsub.s32 0, %v315_v20 }
  0x14   : > { %v386_v15 = vld [vmem:[%s1797_s3] sm:$0xff]  ;;  %v387_v62 = vld [vmem:[%s1797_s3 + $0x8] sm:$0xff]  ;;  %v388_v63 = vld [vmem:[%s1797_s3 + $0x10] sm:$0xff] }
  0x15   : > { %1455 = vset.pattern.permute.xlu1 %v1514_v2  ;;  %327 = vperm.xlu0 %1453, %v291_v4   ;;  %v1233_v16 = vld [vmem:[%s1798_s4 + $0x20] sm:$0xff] }
  0x16   : > { %331 = vperm.xlu1 %1455, %v292_v1   ;;  %1349 = vmatprep.mubr.msk.f32.mxu0 %vm415_vm0, %v386_v15  ;;  %v289_v26 = vld [vmem:[%s282_s21] sm:$0x3] }
  0x17   : > { %v341_v28 = vrot.slane %v289_v26, %v340_v23  ;;  %v317_v29 = vrot.slane %v289_v26, %v316_v24  ;;  %v1241_v1 = vld [vmem:[%s1797_s3 + $0x20] sm:$0xff]  ;;  %v1243_v23 = vld [vmem:[%s1797_s3 + $0x30] sm:$0xff]  ;;  %v1244_v24 = vld [vmem:[%s1797_s3 + $0x38] sm:$0xff] }
  0x18   : > { %1363 = vmatprep.mubr.msk.f32.mxu1 %vm415_vm0, %v1241_v1 }
  0x19   : > { %1457 = vset.pattern.permute.xlu0 %v1515_v3 }
  0x1a   : > { %1456 = vset.pattern.permute.xlu1 %v1515_v3  ;;  %311 = vperm.xlu0 %1457, %v293_v0   ;;  %v389_v0 = vld [vmem:[%s1797_s3 + $0x18] sm:$0xff] }
  0x1b   : > { %301 = vperm.xlu1 %1456, %v291_v4  }
  0x1e   : > { %296 = vperm.xlu0 %1457, %v290_v5  }
  0x1f   : > { %371 = vperm.xlu1 %1456, %v353_v6  }
  0x22   : > { %361 = vperm.xlu0 %1457, %v351_v7  }
  0x23   : > { %1458 = vset.pattern.permute.xlu1 %v1514_v2 }
  0x24   : > { %323 = vperm.xlu1 %1458, %v290_v5  }
  0x26   : > { %412 = vperm.xlu0 %1457, %v1236_v8  }
  0x28   : > { %1459 = vset.pattern.permute.xlu1 %v1515_v3 }
  0x29   : > { %366 = vperm.xlu1 %1459, %v352_v9  }
  0x2a   : > { %402 = vperm.xlu0 %1457, %v1234_v10  }
  0x2d   : > { %356 = vperm.xlu1 %1459, %v350_v11  }
  0x2e   : > { %533 = vperm.xlu0 %1457, %v1245_v12  }
  0x31   : > { %407 = vperm.xlu1 %1459, %v1235_v13  }
  0x32   : > { %543 = vperm.xlu0 %1457, %v1247_v14  }
  0x35   : > { %397 = vperm.xlu1 %1459, %v1233_v16  }
  0x39   : > { %538 = vperm.xlu1 %1459, %v1246_v17  }
  0x3d   : > { %548 = vperm.xlu1 %1459, %v1248_v18  }
  0x8c   : > { %v307_v21 = vpop.permute.xlu1 %306  ;;  %v336_v22 = vpop.permute.xlu0 %335 }
  0x8d   : > { %v345_v30 = vmul.f32 %v341_v28, %v336_v22  ;;  %v320_v45 = vmul.f32 %v317_v29, %v307_v21  ;;  %v1242_v22 = vld [vmem:[%s1797_s3 + $0x28] sm:$0xff] }
  0x90   : > { %v328_v25 = vpop.permute.xlu0 %327 }
  0x91   : > { %v332_v27 = vpop.permute.xlu1 %331  ;;  %v343_v38 = vmul.f32 %v341_v28, %v328_v25 }
  0x92   : > { %v344_v41 = vmul.f32 %v341_v28, %v332_v27 }
  0x94   : > { %v348_v50 = vadd.f32 %v344_v41, %v320_v45 }
  0x95   : > { %v312_v31 = vpop.permute.xlu0 %311 }
  0x96   : > { %v321_v32 = vmul.f32 %v317_v29, %v312_v31  ;;  %v302_v33 = vpop.permute.xlu1 %301 }
  0x97   : > { %v319_v39 = vmul.f32 %v317_v29, %v302_v33  ;;  %v1253_v33 = vld [vmem:[%s288_s19] ss:$0 sm:$0xff] }
  0x98   : > { %v349_v34 = vadd.f32 %v345_v30, %v321_v32 }
  0x99   : > { %v297_v35 = vpop.permute.xlu0 %296  ;;  %v347_v46 = vadd.f32 %v343_v38, %v319_v39 }
  0x9a   : > { %v372_v36 = vpop.permute.xlu1 %371  ;;  %v318_v47 = vmul.f32 %v317_v29, %v297_v35 }
  0x9b   : > { %v377_v37 = vadd.f32 %v372_v36, %v349_v34 }
  0x9d   : > { %v381_v40 = vmul.f32 0.2, %v377_v37  ;;  %v362_v44 = vpop.permute.xlu0 %361 }
  0x9e   : > { %v375_v48 = vadd.f32 %v362_v44, %v347_v46 }
  0x9f   : > { %v324_v42 = vpop.permute.xlu1 %323  ;;  %v385_v43 = vmax.f32 %v377_v37, %v381_v40 }
  0xa0   : > { %v342_v49 = vmul.f32 %v341_v28, %v324_v42  ;;  %v379_v53 = vmul.f32 0.2, %v375_v48 }
  0xa1   : > { %1341 = vmatprep.subr.mxu0 %v385_v43  ;;  %v413_v2 = vpop.permute.xlu0 %412 }
  0xa2   : > { %1342 = vmatpush3.msra.mxu0 %v385_v43  ;;  %v346_v55 = vadd.f32 %v342_v49, %v318_v47  ;;  %v383_v59 = vmax.f32 %v375_v48, %v379_v53 }
  0xa4   : > { %v367_v51 = vpop.permute.xlu1 %366 }
  0xa5   : > { %v376_v52 = vadd.f32 %v367_v51, %v348_v50  ;;  %v403_v6 = vpop.permute.xlu0 %402 }
  0xa7   : > { %v380_v54 = vmul.f32 0.2, %v376_v52 }
  0xa8   : > { %v357_v56 = vpop.permute.xlu1 %356 }
  0xa9   : > { %v384_v57 = vmax.f32 %v376_v52, %v380_v54  ;;  %v374_v58 = vadd.f32 %v357_v56, %v346_v55  ;;  %v534_v26 = vpop.permute.xlu0 %533 }
  0xab   : > { %v378_v60 = vmul.f32 0.2, %v374_v58  ;;  %1343 = vmatprep.subr.mxu0 %v384_v57 }
  0xac   : > { %1344 = vmatpush3.msra.mxu0 %v384_v57  ;;  %v408_v3 = vpop.permute.xlu1 %407 }
  0xad   : > { %v382_v61 = vmax.f32 %v374_v58, %v378_v60  ;;  %1345 = vmatprep.subr.mxu0 %v383_v59  ;;  %v544_v38 = vpop.permute.xlu0 %543 }
  0xae   : > { %1346 = vmatpush3.msra.mxu0 %v383_v59 }
  0xaf   : > { %1347 = vmatprep.subr.mxu0 %v382_v61 }
  0xb0   : > { %1348 = vmatpush3.msra.mxu0 %v382_v61  ;;  %v398_v10 = vpop.permute.xlu1 %397 }
  0xb1   : > { %1350 = vmatmul.mubr.msk.f32.vlgmr.msra.gmra.mxu0 %vm415_vm0, %v387_v62 }
  0xb2   : > { %1352 = vmatprep.mubr.msk.f32.mxu0 %vm415_vm0, %v388_v63 }
  0xb4   : > { %v539_v25 = vpop.permute.xlu1 %538 }
  0xb5   : > { %1353 = vmatmul.mubr.msk.f32.gmra.mxu0 %vm415_vm0, %v389_v0 }
  0xb8   : > { %v549_v32 = vpop.permute.xlu1 %548 }
 0x171   : > { %v1351_v4 = vpop.f32.mrf.mxu0 }
 0x172   : > { %v500_v8 = vadd.f32 %v1351_v4, %v403_v6 }
 0x173   : > { %v494_v5 = vpop.f32.mrf.mxu0 }
 0x174   : > { %v495_v12 = vadd.f32 %v494_v5, %v398_v10  ;;  %v514_v15 = vmul.f32 0.2, %v500_v8 }
 0x175   : > { %v1354_v7 = vpop.f32.mrf.mxu0 }
 0x176   : > { %v510_v9 = vadd.f32 %v1354_v7, %v413_v2  ;;  %v513_v18 = vmul.f32 0.2, %v495_v12  ;;  %v518_v20 = vmax.f32 %v500_v8, %v514_v15 }
 0x177   : > { %v504_v11 = vpop.f32.mrf.mxu0 }
 0x178   : > { %v516_v13 = vmul.f32 0.2, %v510_v9  ;;  %v505_v14 = vadd.f32 %v504_v11, %v408_v3  ;;  %v517_v21 = vmax.f32 %v495_v12, %v513_v18 }
 0x17a   : > { %v515_v16 = vmul.f32 0.2, %v505_v14  ;;  %v520_v17 = vmax.f32 %v510_v9, %v516_v13 }
 0x17c   : > { %v519_v19 = vmax.f32 %v505_v14, %v515_v16  ;;  %1355 = vmatprep.subr.mxu1 %v520_v17 }
 0x17d   : > { %1356 = vmatpush3.msra.mxu1 %v520_v17 }
 0x17e   : > { %1357 = vmatprep.subr.mxu1 %v519_v19 }
 0x17f   : > { %1358 = vmatpush3.msra.mxu1 %v519_v19 }
 0x180   : > { %1359 = vmatprep.subr.mxu1 %v518_v20 }
 0x181   : > { %1360 = vmatpush3.msra.mxu1 %v518_v20 }
 0x182   : > { %1361 = vmatprep.subr.mxu1 %v517_v21 }
 0x183   : > { %1362 = vmatpush3.msra.mxu1 %v517_v21 }
 0x184   : > { %1364 = vmatmul.mubr.msk.f32.vlgmr.msra.gmra.mxu1 %vm415_vm0, %v1242_v22 }
 0x185   : > { %1366 = vmatprep.mubr.msk.f32.mxu1 %vm415_vm0, %v1243_v23 }
 0x188   : > { %1367 = vmatmul.mubr.msk.f32.gmra.mxu1 %vm415_vm0, %v1244_v24 }
 0x244   : > { %v1365_v27 = vpop.f32.mrf.mxu1 }
 0x245   : > { %v635_v28 = vadd.f32 %v1365_v27, %v539_v25 }
 0x246   : > { %v629_v29 = vpop.f32.mrf.mxu1 }
 0x247   : > { %v649_v30 = vmul.f32 0.2, %v635_v28  ;;  %v630_v31 = vadd.f32 %v629_v29, %v534_v26 }
 0x248   : > { %v1368_v34 = vpop.f32.mrf.mxu1 }
 0x249   : > { %v653_v35 = vmax.f32 %v635_v28, %v649_v30  ;;  %v648_v36 = vmul.f32 0.2, %v630_v31  ;;  %v645_v37 = vadd.f32 %v1368_v34, %v549_v32 }
 0x24a   : > { %v639_v39 = vpop.f32.mrf.mxu1 }
 0x24b   : > { %v664_v40 = vmul.f32 %v1253_v33, %v653_v35  ;;  %v652_v41 = vmax.f32 %v630_v31, %v648_v36  ;;  %v651_v42 = vmul.f32 0.2, %v645_v37  ;;  %v640_v43 = vadd.f32 %v639_v39, %v544_v38 }
 0x24d   : > { %v663_v44 = vmul.f32 %v1253_v33, %v652_v41  ;;  %v655_v45 = vmax.f32 %v645_v37, %v651_v42  ;;  %v650_v46 = vmul.f32 0.2, %v640_v43  ;;  %670 = sbr.rel (%p1254_p5) target bundleno = 597 (0x255), region = 48 }
 0x24f   : > { %v666_v47 = vmul.f32 %v1253_v33, %v655_v45  ;;  %v654_v48 = vmax.f32 %v640_v43, %v650_v46 }
 0x251   : > { %v665_v49 = vmul.f32 %v1253_v33, %v654_v48 }
 0x252   : > { %vm671_vm1 = vcmask 130048  }
 0x253   : > { %672 = vst.msk [vmem:[#allocation2] sm:$0xff] %vm671_vm1, %v663_v44  ;;  %673 = vst.msk [vmem:[#allocation2 + $0x8] sm:$0xff] %vm671_vm1, %v664_v40 }
 0x254   : > { %674 = vst.msk [vmem:[#allocation2 + $0x10] sm:$0xff] %vm671_vm1, %v665_v49  ;;  %675 = vst.msk [vmem:[#allocation2 + $0x18] sm:$0xff] %vm671_vm1, %v666_v47 }
 0x255 PF: > { %p1255_p6 = scmp.le.s32.totalorder %s1504_s23, 0 }
 0x257   : > { %679 = sbr.rel (%p1255_p6) target bundleno = 609 (0x261), region = 52 }
 0x25c   : > { %v680_v50 = vld [vmem:[#allocation2] sm:$0xff]  ;;  %vm688_vm2 = vcmask 130048   ;;  %v681_v51 = vld [vmem:[#allocation2 + $0x8] sm:$0xff]  ;;  %v682_v52 = vld [vmem:[#allocation2 + $0x10] sm:$0xff] }
 0x25d   : > { %v684_v53 = vadd.f32 %v680_v50, %v663_v44  ;;  %v685_v54 = vadd.f32 %v681_v51, %v664_v40  ;;  %v686_v55 = vadd.f32 %v682_v52, %v665_v49  ;;  %v683_v56 = vld [vmem:[#allocation2 + $0x18] sm:$0xff] }
 0x25e   : > { %v687_v57 = vadd.f32 %v683_v56, %v666_v47 }
 0x25f   : > { %689 = vst.msk [vmem:[#allocation2] sm:$0xff] %vm688_vm2, %v684_v53  ;;  %690 = vst.msk [vmem:[#allocation2 + $0x8] sm:$0xff] %vm688_vm2, %v685_v54 }
 0x260   : > { %691 = vst.msk [vmem:[#allocation2 + $0x10] sm:$0xff] %vm688_vm2, %v686_v55  ;;  %692 = vst.msk [vmem:[#allocation2 + $0x18] sm:$0xff] %vm688_vm2, %v687_v57 }
 0x261 PF: > { %p1256_p7 = scmp.ne.s32.totalorder %s1504_s23, 7 }
 0x262   : > { %s1149_s12 = sld [smem:[#allocation3]] (!%p1256_p7) }
 0x263   : > { %696 = sbr.rel (%p1256_p7) target bundleno = 1272 (0x4f8), region = 56 }
 0x268   : > { %v700_v58 = vld [vmem:[#allocation2 + $0x18] sm:$0xff]  ;;  %v699_v59 = vld [vmem:[#allocation2 + $0x10] sm:$0xff]  ;;  %v1257_v60 = vld [vmem:[%s1797_s3 + $0x40] sm:$0xff]  ;;  %v1516_v61 = vmov 0   ;;  %vm1135_vm3 = vcmask 130048   ;;  %vm1152_vm4 = vcmask 122880  }
 0x269   : > { %1369 = vmatprep.subr.mxu0 %v700_v58  ;;  %1460 = vset.pattern.permute.xlu0 %v1516_v61  ;;  %v698_v62 = vld [vmem:[#allocation2 + $0x8] sm:$0xff]  ;;  %v1264_v63 = vld [vmem:[%s1798_s4 + $0x78] sm:$0xff]  ;;  %v697_v1 = vld [vmem:[#allocation2] sm:$0xff] }
 0x26a   : > { %1370 = vmatpush3.msra.mxu0 %v700_v58  ;;  %1377 = vmatprep.mubr.msk.f32.mxu0 %vm415_vm0, %v1257_v60  ;;  %v1262_v0 = vld [vmem:[%s1798_s4 + $0x68] sm:$0xff]  ;;  %v1263_v2 = vld [vmem:[%s1798_s4 + $0x70] sm:$0xff]  ;;  %v1261_v4 = vld [vmem:[%s1798_s4 + $0x60] sm:$0xff] }
 0x26b   : > { %1371 = vmatprep.subr.mxu0 %v699_v59  ;;  %728 = vperm.xlu0 %1460, %v1264_v63   ;;  %v1258_v3 = vld [vmem:[%s1797_s3 + $0x48] sm:$0xff]  ;;  %v1259_v5 = vld [vmem:[%s1797_s3 + $0x50] sm:$0xff]  ;;  %v1276_v6 = vld [vmem:[%s1798_s4 + $0x98] sm:$0xff] }
 0x26c   : > { %1372 = vmatpush3.msra.mxu0 %v699_v59  ;;  %1461 = vset.pattern.permute.xlu1 %v1516_v61  ;;  %v1260_v7 = vld [vmem:[%s1797_s3 + $0x58] sm:$0xff]  ;;  %v1275_v8 = vld [vmem:[%s1798_s4 + $0x90] sm:$0xff]  ;;  %v1274_v9 = vld [vmem:[%s1798_s4 + $0x88] sm:$0xff] }
 0x26d   : > { %1373 = vmatprep.subr.mxu0 %v698_v62  ;;  %718 = vperm.xlu1 %1461, %v1262_v0   ;;  %v1273_v10 = vld [vmem:[%s1798_s4 + $0x80] sm:$0xff]  ;;  %v1286_v12 = vld [vmem:[%s1798_s4 + $0xa8] sm:$0xff]  ;;  %v1287_v13 = vld [vmem:[%s1798_s4 + $0xb0] sm:$0xff] }
 0x26e   : > { %1374 = vmatpush3.msra.mxu0 %v698_v62  ;;  %v1285_v11 = vld [vmem:[%s1798_s4 + $0xa0] sm:$0xff]  ;;  %v1288_v14 = vld [vmem:[%s1798_s4 + $0xb8] sm:$0xff]  ;;  %v1294_v16 = vld [vmem:[%s1798_s4 + $0xc8] sm:$0xff] }
 0x26f   : > { %1375 = vmatprep.subr.mxu0 %v697_v1  ;;  %723 = vperm.xlu0 %1460, %v1263_v2   ;;  %v1293_v15 = vld [vmem:[%s1798_s4 + $0xc0] sm:$0xff]  ;;  %v1295_v17 = vld [vmem:[%s1798_s4 + $0xd0] sm:$0xff]  ;;  %v1296_v18 = vld [vmem:[%s1798_s4 + $0xd8] sm:$0xff] }
 0x270   : > { %1376 = vmatpush3.msra.mxu0 %v697_v1  ;;  %v1269_v19 = vld [vmem:[%s1797_s3 + $0x60] sm:$0xff]  ;;  %v1270_v40 = vld [vmem:[%s1797_s3 + $0x68] sm:$0xff]  ;;  %v1271_v41 = vld [vmem:[%s1797_s3 + $0x70] sm:$0xff] }
 0x271   : > { %1378 = vmatmul.mubr.msk.f32.vlgmr.msra.gmra.mxu0 %vm415_vm0, %v1258_v3  ;;  %713 = vperm.xlu1 %1461, %v1261_v4   ;;  %v1272_v42 = vld [vmem:[%s1797_s3 + $0x78] sm:$0xff]  ;;  %v1281_v43 = vld [vmem:[%s1797_s3 + $0x80] sm:$0xff]  ;;  %v1283_v44 = vld [vmem:[%s1797_s3 + $0x90] sm:$0xff] }
 0x272   : > { %1380 = vmatprep.mubr.msk.f32.mxu0 %vm415_vm0, %v1259_v5  ;;  %1391 = vmatprep.mubr.msk.f32.mxu1 %vm415_vm0, %v1269_v19  ;;  %v1282_v1 = vld [vmem:[%s1797_s3 + $0x88] sm:$0xff]  ;;  %v1284_v2 = vld [vmem:[%s1797_s3 + $0x98] sm:$0xff] }
 0x273   : > { %863 = vperm.xlu0 %1460, %v1276_v6  }
 0x275   : > { %1381 = vmatmul.mubr.msk.f32.gmra.mxu0 %vm415_vm0, %v1260_v7  ;;  %858 = vperm.xlu1 %1461, %v1275_v8  }
 0x276   : > { %1405 = vmatprep.mubr.msk.f32.mxu0 %vm415_vm0, %v1281_v43  ;;  %v1150_v43 = vstv %s1149_s12 }
 0x277   : > { %853 = vperm.xlu0 %1460, %v1274_v9  }
 0x279   : > { %848 = vperm.xlu1 %1461, %v1273_v10  }
 0x27b   : > { %983 = vperm.xlu0 %1460, %v1285_v11  }
 0x27d   : > { %988 = vperm.xlu1 %1461, %v1286_v12  }
 0x27f   : > { %993 = vperm.xlu0 %1460, %v1287_v13  }
 0x281   : > { %998 = vperm.xlu1 %1461, %v1288_v14  }
 0x283   : > { %1113 = vperm.xlu0 %1460, %v1293_v15  }
 0x285   : > { %1118 = vperm.xlu1 %1461, %v1294_v16  }
 0x287   : > { %1123 = vperm.xlu0 %1460, %v1295_v17  }
 0x289   : > { %1128 = vperm.xlu1 %1461, %v1296_v18  }
 0x2e6   : > { %v729_v20 = vpop.permute.xlu0 %728 }
 0x2e8   : > { %v719_v21 = vpop.permute.xlu1 %718 }
 0x2ea   : > { %v724_v25 = vpop.permute.xlu0 %723 }
 0x2ec   : > { %v714_v28 = vpop.permute.xlu1 %713 }
 0x2ee   : > { %v864_v45 = vpop.permute.xlu0 %863 }
 0x2f0   : > { %v859_v46 = vpop.permute.xlu1 %858 }
 0x2f2   : > { %v854_v49 = vpop.permute.xlu0 %853 }
 0x2f4   : > { %v849_v53 = vpop.permute.xlu1 %848 }
 0x2f6   : > { %v984_v3 = vpop.permute.xlu0 %983 }
 0x2f8   : > { %v989_v4 = vpop.permute.xlu1 %988 }
 0x2fa   : > { %v994_v5 = vpop.permute.xlu0 %993 }
 0x2fc   : > { %v999_v6 = vpop.permute.xlu1 %998 }
 0x2fe   : > { %v1114_v9 = vpop.permute.xlu0 %1113 }
 0x300   : > { %v1119_v18 = vpop.permute.xlu1 %1118 }
 0x331   : > { %v1379_v22 = vpop.f32.mrf.mxu0 }
 0x332   : > { %v815_v26 = vadd.f32 %v1379_v22, %v719_v21 }
 0x333   : > { %v809_v23 = vpop.f32.mrf.mxu0 }
 0x334   : > { %v810_v30 = vadd.f32 %v809_v23, %v714_v28  ;;  %v829_v33 = vmul.f32 0.2, %v815_v26 }
 0x335   : > { %v1382_v24 = vpop.f32.mrf.mxu0 }
 0x336   : > { %v825_v27 = vadd.f32 %v1382_v24, %v729_v20  ;;  %v828_v36 = vmul.f32 0.2, %v810_v30  ;;  %v833_v38 = vmax.f32 %v815_v26, %v829_v33  ;;  %v1124_v26 = vpop.permute.xlu0 %1123 }
 0x337   : > { %v819_v29 = vpop.f32.mrf.mxu0 }
 0x338   : > { %v831_v31 = vmul.f32 0.2, %v825_v27  ;;  %v820_v32 = vadd.f32 %v819_v29, %v724_v25  ;;  %v832_v39 = vmax.f32 %v810_v30, %v828_v36  ;;  %v1129_v29 = vpop.permute.xlu1 %1128 }
 0x33a   : > { %v830_v34 = vmul.f32 0.2, %v820_v32  ;;  %v835_v35 = vmax.f32 %v825_v27, %v831_v31 }
 0x33c   : > { %v834_v37 = vmax.f32 %v820_v32, %v830_v34  ;;  %1383 = vmatprep.subr.mxu1 %v835_v35 }
 0x33d   : > { %1384 = vmatpush3.msra.mxu1 %v835_v35 }
 0x33e   : > { %1385 = vmatprep.subr.mxu1 %v834_v37 }
 0x33f   : > { %1386 = vmatpush3.msra.mxu1 %v834_v37 }
 0x340   : > { %1387 = vmatprep.subr.mxu1 %v833_v38 }
 0x341   : > { %1388 = vmatpush3.msra.mxu1 %v833_v38 }
 0x342   : > { %1389 = vmatprep.subr.mxu1 %v832_v39 }
 0x343   : > { %1390 = vmatpush3.msra.mxu1 %v832_v39 }
 0x344   : > { %1392 = vmatmul.mubr.msk.f32.vlgmr.msra.gmra.mxu1 %vm415_vm0, %v1270_v40 }
 0x345   : > { %1394 = vmatprep.mubr.msk.f32.mxu1 %vm415_vm0, %v1271_v41 }
 0x348   : > { %1395 = vmatmul.mubr.msk.f32.gmra.mxu1 %vm415_vm0, %v1272_v42 }
 0x349   : > { %1408 = vmatprep.mubr.msk.f32.mxu1 %vm415_vm0, %v1283_v44 }
 0x404   : > { %v1393_v47 = vpop.f32.mrf.mxu1 }
 0x405   : > { %v950_v51 = vadd.f32 %v1393_v47, %v854_v49 }
 0x406   : > { %v944_v48 = vpop.f32.mrf.mxu1 }
 0x407   : > { %v945_v55 = vadd.f32 %v944_v48, %v849_v53  ;;  %v964_v58 = vmul.f32 0.2, %v950_v51 }
 0x408   : > { %v1396_v50 = vpop.f32.mrf.mxu1 }
 0x409   : > { %v960_v52 = vadd.f32 %v1396_v50, %v864_v45  ;;  %v963_v61 = vmul.f32 0.2, %v945_v55  ;;  %v968_v63 = vmax.f32 %v950_v51, %v964_v58 }
 0x40a   : > { %v954_v54 = vpop.f32.mrf.mxu1 }
 0x40b   : > { %v966_v56 = vmul.f32 0.2, %v960_v52  ;;  %v955_v57 = vadd.f32 %v954_v54, %v859_v46  ;;  %v967_v0 = vmax.f32 %v945_v55, %v963_v61 }
 0x40d   : > { %v970_v59 = vmax.f32 %v960_v52, %v966_v56  ;;  %v965_v60 = vmul.f32 0.2, %v955_v57 }
 0x40f   : > { %v969_v62 = vmax.f32 %v955_v57, %v965_v60  ;;  %1397 = vmatprep.subr.mxu0 %v970_v59  ;;  %1411 = vmatprep.subr.mxu1 %v970_v59 }
 0x410   : > { %1398 = vmatpush3.msra.mxu0 %v970_v59  ;;  %1415 = vmatpush3.msra.mxu1 %v970_v59 }
 0x411   : > { %1399 = vmatprep.subr.mxu0 %v969_v62  ;;  %1412 = vmatprep.subr.mxu1 %v969_v62 }
 0x412   : > { %1400 = vmatpush3.msra.mxu0 %v969_v62  ;;  %1416 = vmatpush3.msra.mxu1 %v969_v62 }
 0x413   : > { %1401 = vmatprep.subr.mxu0 %v968_v63  ;;  %1413 = vmatprep.subr.mxu1 %v968_v63 }
 0x414   : > { %1402 = vmatpush3.msra.mxu0 %v968_v63  ;;  %1417 = vmatpush3.msra.mxu1 %v968_v63 }
 0x415   : > { %1403 = vmatprep.subr.mxu0 %v967_v0  ;;  %1414 = vmatprep.subr.mxu1 %v967_v0 }
 0x416   : > { %1404 = vmatpush3.msra.mxu0 %v967_v0  ;;  %1418 = vmatpush3.msra.mxu1 %v967_v0 }
 0x417   : > { %1406 = vmatmul.mubr.msk.f32.vlgmr.msra.gmra.mxu0 %vm415_vm0, %v1282_v1  ;;  %1409 = vmatmul.mubr.msk.f32.vlgmr.msra.gmra.mxu1 %vm415_vm0, %v1284_v2 }
 0x4d7   : > { %v1407_v7 = vpop.f32.mrf.mxu0  ;;  %v1410_v8 = vpop.f32.mrf.mxu1 }
 0x4d8   : > { %v1085_v10 = vadd.f32 %v1407_v7, %v989_v4  ;;  %v1095_v11 = vadd.f32 %v1410_v8, %v999_v6 }
 0x4d9   : > { %v1079_v12 = vpop.f32.mrf.mxu0  ;;  %v1089_v13 = vpop.f32.mrf.mxu1 }
 0x4da   : > { %v1099_v14 = vmul.f32 0.2, %v1085_v10  ;;  %v1101_v15 = vmul.f32 0.2, %v1095_v11  ;;  %v1080_v16 = vadd.f32 %v1079_v12, %v984_v3  ;;  %v1090_v17 = vadd.f32 %v1089_v13, %v994_v5 }
 0x4dc   : > { %v1103_v19 = vmax.f32 %v1085_v10, %v1099_v14  ;;  %v1098_v20 = vmul.f32 0.2, %v1080_v16  ;;  %v1100_v21 = vmul.f32 0.2, %v1090_v17  ;;  %v1105_v23 = vmax.f32 %v1095_v11, %v1101_v15 }
 0x4de   : > { %v1132_v22 = vmul.f32 %v1119_v18, %v1103_v19  ;;  %v1102_v24 = vmax.f32 %v1080_v16, %v1098_v20  ;;  %v1104_v25 = vmax.f32 %v1090_v17, %v1100_v21  ;;  %v1134_v31 = vmul.f32 %v1129_v29, %v1105_v23 }
 0x4e0   : > { %v1131_v27 = vmul.f32 %v1114_v9, %v1102_v24  ;;  %v1133_v28 = vmul.f32 %v1124_v26, %v1104_v25  ;;  %v1137_v30 = vsel %vm1135_vm3, %v1132_v22, 0.0  ;;  %v1141_v36 = vsel %vm1135_vm3, %v1134_v31, 0.0 }
 0x4e2   : > { %v1136_v32 = vsel %vm1135_vm3, %v1131_v27, 0.0  ;;  %v1139_v34 = vsel %vm1135_vm3, %v1133_v28, 0.0 }
 0x4e3   : > { %v1138_v33 = vadd.f32 %v1137_v30, %v1136_v32 }
 0x4e5   : > { %v1140_v35 = vadd.f32 %v1139_v34, %v1138_v33 }
 0x4e7   : > { %v1142_v37 = vadd.f32 %v1141_v36, %v1140_v35 }
 0x4e9   : > { %v1143_v38 = vrot.slane %v1142_v37, 4 }
 0x4eb   : > { %v1144_v39 = vadd.f32 %v1143_v38, %v1142_v37 }
 0x4ed   : > { %v1145_v40 = vrot.slane %v1144_v39, 2 }
 0x4ef   : > { %v1146_v41 = vadd.f32 %v1145_v40, %v1144_v39 }
 0x4f1   : > { %v1147_v42 = vrot.slane %v1146_v41, 1 }
 0x4f3   : > { %v1148_v44 = vadd.f32 %v1147_v42, %v1146_v41 }
 0x4f5   : > { %v1151_v45 = vadd.f32 %v1150_v43, %v1148_v44 }
 0x4f7   : > { %1153 = vst.msk [vmem:[#allocation4] sm:$0x1] %vm1152_vm4, %v1151_v45 }
 0x4f8 PF: > { %p1770_p8 = scmp.eq.s32.totalorder %s1228_s5, 7  ;;  %s1517_s14 = smov [#allocation4]  }
 0x4f9   : > { %s1163_s15 = sshll.u32 %s1517_s14, 4  ;;  %s1164_s15 = int_to_ptr.vmem [resolvable:$true] %s1163_s15 }
 0x4fa   : > { %s1462_s16 = scalar_lea.vmem %s1164_s15, 16  ;;  %s1468_s18 = scalar_lea.vmem %s1164_s15, 32 }
 0x4fb   : > { %p1463_p9 = scmp.ne.s32.totalorder %s1164_s15, %s1462_s16  ;;  %p1469_p12 = scmp.lt.s32.totalorder %s1164_s15, %s1164_s15 }
 0x4fc   : > { %p1470_p13 = scmp.lt.s32.totalorder %s1468_s18, %s1462_s16 }
 0x4fd   : > { %p1464_p10 = pnand %p1463_p9, %p1770_p8 }
 0x4fe   : > { %p1471_p0 = por %p1470_p13, %p1469_p12 }
 0x4ff   : > { %p1465_p11 = pneg %p1464_p10 }
 0x501   : > { %p1472_p1 = pnand %p1471_p0, %p1465_p11 }
 0x503   : > { %1475 = shalt.err (!%p1472_p1)
}
 0x504   : > { %1420 = dma.vmem_to_hbm [thread:$0]  (%p1770_p8), %s1164_s15, 16, %s1800_s6, [#allocation5]  }
 0x505   : > { %1499 = dma.done.wait (%p1770_p8), [#allocation5], 16  }
 0x506   : > { %1501 = vsyncadd (%p1770_p8), [#allocation5], 4294967280 }
 0x507 PF: > { %s18_s25 = sadd.s32 1, %s1512_s25   ;;  %s1802_s23 = smov %s1508_s24 }
 0x508   : > { %p15_p2 = scmp.ge.s32.totalorder %s18_s25, 10   ;;  %s1803_s24 = smov %s1805_s26 }
 0x50a   :  { %17 = sbr.rel (!%p15_p2) target bundleno = 4 (0x4), region = 97 }
 0x50f   :  { %1176 = vsyncpa [#allocation5], 1 }
 0x510   :  { %1178 = vsyncpa [#allocation5 + $0x1], 1 }

</bundles_post_ra>
